<compile_context>
chip_gen: v7x
topology: tpu7x:2x2x1
jax: 0.10.0
libtpu: 0.0.40
codegen_flags: <defaults>
</compile_context>

<pallas_src>
import jax
import jax.numpy as jnp
from jax.experimental import pallas as pl
from jax.experimental.pallas import tpu as pltpu

IN_FEATURES = 13
H1 = 64
H2 = 32


def classifier_kernel(x_ref, w1_ref, w2_ref, packed_ref, out_ref):
    # x tile: (TILE_N, 13) f32
    x = x_ref[...]

    # Packed small params: (4, 128) f32
    #   row 0, lanes [0:64)  -> b1
    #   row 1, lanes [0:32)  -> b2
    #   row 2, lanes [0:32)  -> w3^T (the (32,1) fc3 weight as a row)
    #   row 3, lane  [0:1)   -> b3
    b1 = packed_ref[0:1, 0:H1]      # (1, 64)
    b2 = packed_ref[1:2, 0:H2]      # (1, 32)
    w3t = packed_ref[2:3, 0:H2]     # (1, 32)
    b3 = packed_ref[3:4, 0:1]       # (1, 1)

    # ---- Linear(13, 64) + ReLU (MXU) ----
    h1 = jnp.dot(x, w1_ref[...], preferred_element_type=jnp.float32) + b1
    h1 = jnp.maximum(h1, 0.0)       # (TILE_N, 64)

    # ---- Linear(64, 32) + ReLU (MXU) ----
    h2 = jnp.dot(h1, w2_ref[...], preferred_element_type=jnp.float32) + b2
    h2 = jnp.maximum(h2, 0.0)       # (TILE_N, 32)

    # ---- Linear(32, 1): VPU multiply + lane reduction instead of a
    #      1-column MXU matmul ----
    out = jnp.sum(h2 * w3t, axis=-1, keepdims=True) + b3   # (TILE_N, 1)
    out_ref[...] = out.astype(out_ref.dtype)


def _pack_small_params(params):
    """Pack b1, b2, w3 (as a row) and b3 into one (4, 128) f32 buffer."""
    packed = jnp.zeros((4, 128), jnp.float32)
    packed = packed.at[0, 0:H1].set(params["b1"].reshape(H1).astype(jnp.float32))
    packed = packed.at[1, 0:H2].set(params["b2"].reshape(H2).astype(jnp.float32))
    packed = packed.at[2, 0:H2].set(params["w3"].reshape(H2).astype(jnp.float32))
    packed = packed.at[3, 0].set(params["b3"].reshape(()).astype(jnp.float32))
    return packed


def classifier_adult_forward(x, params, *, tile_n=512):
    """x: (N, 13) float32. params: dict of weights. Returns (N, 1) float32."""
    x = x.astype(jnp.float32)
    n = x.shape[0]
    # Batch tile: multiple of 8, capped at `tile_n`, never larger than needed.
    tn = min(tile_n, ((n + 7) // 8) * 8)
    grid = (pl.cdiv(n, tn),)

    packed = _pack_small_params(params)

    return pl.pallas_call(
        classifier_kernel,
        out_shape=jax.ShapeDtypeStruct((n, 1), jnp.float32),
        grid=grid,
        in_specs=[
            pl.BlockSpec((tn, IN_FEATURES), lambda i: (i, 0)),   # x: streamed
            pl.BlockSpec((IN_FEATURES, H1), lambda i: (0, 0)),   # w1: resident
            pl.BlockSpec((H1, H2), lambda i: (0, 0)),            # w2: resident
            pl.BlockSpec((4, 128), lambda i: (0, 0)),            # packed: resident
        ],
        out_specs=pl.BlockSpec((tn, 1), lambda i: (i, 0)),
        compiler_params=pltpu.CompilerParams(
            dimension_semantics=("parallel",)),
    )(x, params["w1"], params["w2"], packed)


def init_params(key):
    """Deterministic init mirroring nn.Linear defaults (uniform +-1/sqrt(fan_in)).

    PyTorch Linear stores weight as (out, in); we store the transpose (in, out)
    so the kernel does x @ W directly.
    """
    k1, k2, k3, k4, k5, k6 = jax.random.split(key, 6)

    def linear(kw, kb, fan_in, fan_out):
        bound = 1.0 / jnp.sqrt(fan_in)
        w = jax.random.uniform(kw, (fan_in, fan_out), jnp.float32, -bound, bound)
        b = jax.random.uniform(kb, (fan_out,), jnp.float32, -bound, bound)
        return w, b

    w1, b1 = linear(k1, k2, IN_FEATURES, H1)
    w2, b2 = linear(k3, k4, H1, H2)
    w3, b3 = linear(k5, k6, H2, 1)
    return {"w1": w1, "b1": b1, "w2": w2, "b2": b2, "w3": w3, "b3": b3}


def reference_forward(x, p):
    """Pure-JAX reference for correctness check."""
    h1 = jnp.maximum(x @ p["w1"] + p["b1"], 0.0)
    h2 = jnp.maximum(h1 @ p["w2"] + p["b2"], 0.0)
    return h2 @ p["w3"] + p["b3"]


if __name__ == "__main__":
    key = jax.random.PRNGKey(0)
    kx, kp = jax.random.split(key)
    params = init_params(kp)

    # Primary check: small batch, single grid step.
    batch = 8
    x = jax.random.normal(kx, (batch, IN_FEATURES), jnp.float32)
    out = jax.block_until_ready(classifier_adult_forward(x, params))
    ref = reference_forward(x, params)
    assert out.shape == (batch, 1), out.shape
    assert jnp.allclose(out, ref, atol=1e-4, rtol=1e-4), (out, ref)

    # Secondary check: ragged batch exercising grid > 1 and edge padding.
    batch2 = 20
    x2 = jax.random.normal(kx, (batch2, IN_FEATURES), jnp.float32)
    out2 = jax.block_until_ready(classifier_adult_forward(x2, params, tile_n=8))
    ref2 = reference_forward(x2, params)
    assert out2.shape == (batch2, 1), out2.shape
    assert jnp.allclose(out2, ref2, atol=1e-4, rtol=1e-4), (out2, ref2)

    print("KERNEL_OK")
</pallas_src>

<mosaic_0001>
module attributes {stable_mosaic.version = 11 : i64} {
  func.func @classifier_kernel(%arg0: i32, %arg1: memref<8x13xf32, #tpu.memory_space<vmem>>, %arg2: memref<13x64xf32, #tpu.memory_space<vmem>>, %arg3: memref<64x32xf32, #tpu.memory_space<vmem>>, %arg4: memref<4x128xf32, #tpu.memory_space<vmem>>, %arg5: memref<8x1xf32, #tpu.memory_space<vmem>>) attributes {dimension_semantics = [#tpu.dimension_semantics<parallel>], iteration_bounds = array<i64: 1>, scalar_prefetch = 0 : i64, scratch_operands = 0 : i64, tpu.core_type = #tpu.core_type<tc>, window_params = [{transform_indices = @transform_0, window_bounds = array<i64: 8, 13>}, {pipeline_mode = #tpu.pipeline_mode<synchronous>, transform_indices = @transform_1, window_bounds = array<i64: 13, 64>}, {pipeline_mode = #tpu.pipeline_mode<synchronous>, transform_indices = @transform_2, window_bounds = array<i64: 64, 32>}, {pipeline_mode = #tpu.pipeline_mode<synchronous>, transform_indices = @transform_3, window_bounds = array<i64: 4, 128>}, {transform_indices = @transform_4, window_bounds = array<i64: 8, 1>}]} {
    %c0 = arith.constant 0 : index
    %c0_0 = arith.constant 0 : index
    %0 = vector.load %arg1[%c0, %c0_0] : memref<8x13xf32, #tpu.memory_space<vmem>>, vector<8x13xf32>
    %c0_1 = arith.constant 0 : index
    %c0_2 = arith.constant 0 : index
    %1 = vector.load %arg4[%c0_1, %c0_2] : memref<4x128xf32, #tpu.memory_space<vmem>>, vector<1x64xf32>
    %c1 = arith.constant 1 : index
    %c0_3 = arith.constant 0 : index
    %2 = vector.load %arg4[%c1, %c0_3] : memref<4x128xf32, #tpu.memory_space<vmem>>, vector<1x32xf32>
    %c2 = arith.constant 2 : index
    %c0_4 = arith.constant 0 : index
    %3 = vector.load %arg4[%c2, %c0_4] : memref<4x128xf32, #tpu.memory_space<vmem>>, vector<1x32xf32>
    %c3 = arith.constant 3 : index
    %c0_5 = arith.constant 0 : index
    %4 = vector.load %arg4[%c3, %c0_5] : memref<4x128xf32, #tpu.memory_space<vmem>>, vector<1x1xf32>
    %c0_6 = arith.constant 0 : index
    %c0_7 = arith.constant 0 : index
    %5 = vector.load %arg2[%c0_6, %c0_7] : memref<13x64xf32, #tpu.memory_space<vmem>>, vector<13x64xf32>
    %cst = arith.constant dense<0.000000e+00> : vector<8x64xf32>
    %6 = tpu.matmul %0, %5, %cst {dimension_numbers = #tpu.dot_dimension_numbers<[1], [0], [0], [1], [0, 0, 1, 1], [], []>} : vector<8x13xf32>, vector<13x64xf32>, vector<8x64xf32> -> vector<8x64xf32>
    %7 = vector.broadcast %1 : vector<1x64xf32> to vector<8x64xf32>
    %8 = arith.addf %6, %7 : vector<8x64xf32>
    %cst_8 = arith.constant 0.000000e+00 : f32
    %9 = vector.broadcast %cst_8 : f32 to vector<8x64xf32>
    %10 = arith.maximumf %8, %9 : vector<8x64xf32>
    %c0_9 = arith.constant 0 : index
    %c0_10 = arith.constant 0 : index
    %11 = vector.load %arg3[%c0_9, %c0_10] : memref<64x32xf32, #tpu.memory_space<vmem>>, vector<64x32xf32>
    %cst_11 = arith.constant dense<0.000000e+00> : vector<8x32xf32>
    %12 = tpu.matmul %10, %11, %cst_11 {dimension_numbers = #tpu.dot_dimension_numbers<[1], [0], [0], [1], [0, 0, 1, 1], [], []>} : vector<8x64xf32>, vector<64x32xf32>, vector<8x32xf32> -> vector<8x32xf32>
    %13 = vector.broadcast %2 : vector<1x32xf32> to vector<8x32xf32>
    %14 = arith.addf %12, %13 : vector<8x32xf32>
    %cst_12 = arith.constant 0.000000e+00 : f32
    %15 = vector.broadcast %cst_12 : f32 to vector<8x32xf32>
    %16 = arith.maximumf %14, %15 : vector<8x32xf32>
    %17 = vector.broadcast %3 : vector<1x32xf32> to vector<8x32xf32>
    %18 = arith.mulf %16, %17 : vector<8x32xf32>
    %cst_13 = arith.constant dense<0.000000e+00> : vector<8xf32>
    %19 = vector.multi_reduction <add>, %18, %cst_13 [1] : vector<8x32xf32> to vector<8xf32>
    %20 = vector.shape_cast %19 : vector<8xf32> to vector<8x1xf32>
    %21 = vector.broadcast %4 : vector<1x1xf32> to vector<8x1xf32>
    %22 = arith.addf %20, %21 : vector<8x1xf32>
    %c0_14 = arith.constant 0 : index
    %c0_15 = arith.constant 0 : index
    %23 = vector.load %arg5[%c0_14, %c0_15] : memref<8x1xf32, #tpu.memory_space<vmem>>, vector<8x1xf32>
    tpu.vector_store %arg5[%c0_14, %c0_15], %22 {strides = array<i32>} : memref<8x1xf32, #tpu.memory_space<vmem>>, vector<8x1xf32>,
    return
  }
  func.func @transform_0(%arg0: i32) -> (i32, i32) {
    %c0_i32 = arith.constant 0 : i32
    %c0_i32_0 = arith.constant 0 : i32
    return %arg0, %c0_i32 : i32, i32
  }
  func.func @transform_1(%arg0: i32) -> (i32, i32) {
    %c0_i32 = arith.constant 0 : i32
    %c0_i32_0 = arith.constant 0 : i32
    %c0_i32_1 = arith.constant 0 : i32
    return %c0_i32, %c0_i32_0 : i32, i32
  }
  func.func @transform_2(%arg0: i32) -> (i32, i32) {
    %c0_i32 = arith.constant 0 : i32
    %c0_i32_0 = arith.constant 0 : i32
    %c0_i32_1 = arith.constant 0 : i32
    return %c0_i32, %c0_i32_0 : i32, i32
  }
  func.func @transform_3(%arg0: i32) -> (i32, i32) {
    %c0_i32 = arith.constant 0 : i32
    %c0_i32_0 = arith.constant 0 : i32
    %c0_i32_1 = arith.constant 0 : i32
    return %c0_i32, %c0_i32_0 : i32, i32
  }
  func.func @transform_4(%arg0: i32) -> (i32, i32) {
    %c0_i32 = arith.constant 0 : i32
    %c0_i32_0 = arith.constant 0 : i32
    return %arg0, %c0_i32 : i32, i32
  }
}

</mosaic_0001>

<bundles_post_ra>
// kernel: tpu_custom_call.1
= control target key start
LH: loop header
LB: loop body
LE: loop exit
PB: predicated region body
PF: predicated region fallthrough
CT: control target
= control target key end

     0   :  { %vm32_vm0 = vcmask 1044480   ;;  %v279_v0 = vmov 0.0|0.0   ;;  %vm280_vm1 = vmmov 1   ;;  %vm281_vm3 = vmmov 0   ;;  %s356_s1 = inlined_call_operand.vmem [shape: f32[13,64], index: 1, kind: input, shape index: {}]   ;;  %s357_s2 = inlined_call_operand.vmem [shape: f32[64,32], index: 2, kind: input, shape index: {}]   ;;  %s358_s0 = inlined_call_operand.vmem [shape: f32[8,13], index: 0, kind: input, shape index: {}]   ;;  %s359_s3 = inlined_call_operand.vmem [shape: f32[4,128], index: 3, kind: input, shape index: {}]   ;;  %s360_s4 = inlined_call_operand.vmem [shape: f32[8,1], index: 4, kind: output, shape index: {}]  }
   0x1   :  { %259 = vmatprep.subr.bf16.mxu0 %v279_v0  ;;  %v22_v1 = vld [vmem:[%s356_s1] sm:$0xff]  ;;  %v23_v2 = vld [vmem:[%s356_s1 + $0x8] sm:$0x1f]  ;;  %vm261_vm2 = vmpackc.low %vm32_vm0, %vm280_vm1  ;;  %263 = vmatprep.subr.bf16.mxu1 %v279_v0  ;;  %v282_v4 = vmov 0.0   ;;  %vm28_vm4 = vcmask 105472   ;;  %vm119_vm5 = vcmask 523264  }
   0x2   :  { %v260_v3 = vpack.c.bf16 %v23_v2, %v22_v1  ;;  %237 = vmatprep.mubr.msk.f32.mxu0 %vm281_vm3, %v282_v4  ;;  %v107_v5 = vld [vmem:[%s357_s2] sm:$0xff]  ;;  %v108_v6 = vld [vmem:[%s357_s2 + $0x8] sm:$0xff]  ;;  %256 = vmatprep.mubr.msk.f32.mxu1 %vm281_vm3, %v282_v4  ;;  %v109_v8 = vld [vmem:[%s357_s2 + $0x10] sm:$0xff]  ;;  %vm199_vm6 = vcmask 261120   ;;  %vm208_vm7 = vcmask 7168  }
   0x3   :  { %v264_v7 = vpack.c.bf16 %v108_v6, %v107_v5  ;;  %v110_v9 = vld [vmem:[%s357_s2 + $0x18] sm:$0xff]  ;;  %v17_v10 = vld [vmem:[%s358_s0] sm:$0xff]  ;;  %v112_v13 = vld [vmem:[%s357_s2 + $0x28] sm:$0xff] }
   0x4   :  { %262 = vmatpush3.bf16.msk.msra.mxu0 %vm261_vm2, %v260_v3  ;;  %v267_v11 = vpack.c.bf16 %v110_v9, %v109_v8  ;;  %v111_v12 = vld [vmem:[%s357_s2 + $0x20] sm:$0xff]  ;;  %v113_v15 = vld [vmem:[%s357_s2 + $0x30] sm:$0xff]  ;;  %v114_v16 = vld [vmem:[%s357_s2 + $0x38] sm:$0xff] }
   0x5   :  { %265 = vmatpush3.bf16.msra.mxu1 %v264_v7  ;;  %v270_v14 = vpack.c.bf16 %v112_v13, %v111_v12  ;;  %v273_v17 = vpack.c.bf16 %v114_v16, %v113_v15  ;;  %v214_v18 = vld [vmem:[%s359_s3] ss:$0 sm:$0xff]  ;;  %v217_v23 = vld [vmem:[%s359_s3 + $0x1] ss:$0 sm:$0xff]  ;;  %v219_v27 = vld [vmem:[%s359_s3 + $0x2] ss:$0 sm:$0xff] }
   0x6   :  { %266 = vmatprep.subr.bf16.mxu1 %v279_v0  ;;  %v220_v31 = vld [vmem:[%s359_s3 + $0x3] ss:$0 sm:$0xff] }
   0x7   :  { %238 = vmatmul.mubr.msk.f32.vlgmr.msra.gmra.mrb[0].mxu0 %vm28_vm4, %v17_v10 }
   0x9   :  { %268 = vmatpush3.bf16.msra.mxu1 %v267_v11 }
   0xa   :  { %269 = vmatprep.subr.bf16.mxu1 %v279_v0 }
   0xd   :  { %271 = vmatpush3.bf16.msra.mxu1 %v270_v14 }
   0xe   :  { %272 = vmatprep.subr.bf16.mxu1 %v279_v0 }
  0x11   :  { %274 = vmatpush3.bf16.msra.mxu1 %v273_v17 }
  0xda   :  { %v102_v19 = vpop.f32.mrb[0].mxu0 }
  0xdb   :  { %v103_v20 = vadd.f32 %v214_v18, %v102_v19  ;;  %v239_v21 = vpop.f32.mrb[1].mxu0 }
  0xdd   :  { %v106_v22 = vmax.f32 %v103_v20, 0.0 }
  0xdf   :  { %257 = vmatmul.mubr.msk.f32.vlgmr.msra.gmra.mrb[0].mxu1 %vm119_vm5, %v106_v22 }
 0x1b2   :  { %v189_v24 = vpop.f32.mrb[0].mxu1 }
 0x1b3   :  { %v190_v25 = vadd.f32 %v217_v23, %v189_v24  ;;  %v258_v26 = vpop.f32.mrb[1].mxu1 }
 0x1b5   :  { %v193_v28 = vmax.f32 %v190_v25, 0.0 }
 0x1b7   :  { %v198_v29 = vmul.f32 %v219_v27, %v193_v28 }
 0x1b9   :  { %v200_v30 = vsel %vm199_vm6, %v198_v29, 0.0 }
 0x1ba   :  { %201 = vadd.xlane.f32.xlu0 %v200_v30 }
 0x247   :  { %v202_v32 = vpop.xlane.xlu0 %201 }
 0x248   :  { %v207_v33 = vadd.f32 %v220_v31, %v202_v32 }
 0x24a   :  { %209 = vst.msk [vmem:[%s360_s4] sm:$0xff] %vm208_vm7, %v207_v33 }

</bundles_post_ra>
